<compile_context>
chip_gen: v7x
topology: tpu7x:2x2x1
jax: 0.10.0
libtpu: 0.0.40
codegen_flags: <defaults>
</compile_context>

<pallas_src>
import numpy as np
import jax
import jax.numpy as jnp
from jax import lax
from jax.experimental import pallas as pl
from jax.experimental.pallas import tpu as pltpu


# ----------------------------------------------------------------------------
# Deterministic parameter construction (mirrors the PyTorch __init__):
#   random matrix -> QR -> LU with partial pivoting -> (P, L, U, s)
# ----------------------------------------------------------------------------
def _lu_with_pivot(a):
    """Return p, l, u with a = p @ l @ u (scipy.linalg.lu convention)."""
    a = np.array(a, dtype=np.float64)
    n = a.shape[0]
    perm = np.eye(n)
    l = np.eye(n)
    u = a.copy()
    for k in range(n - 1):
        piv = int(np.argmax(np.abs(u[k:, k]))) + k
        if piv != k:
            u[[k, piv], :] = u[[piv, k], :]
            perm[[k, piv], :] = perm[[piv, k], :]
            l[[k, piv], :k] = l[[piv, k], :k]
        for i in range(k + 1, n):
            l[i, k] = u[i, k] / u[k, k]
            u[i, k:] -= l[i, k] * u[k, k:]
    return perm.T, l, u


def init_params(in_channel, seed=0):
    rng = np.random.RandomState(seed)
    weight = rng.randn(in_channel, in_channel)
    q, _ = np.linalg.qr(weight)
    w_p, w_l, w_u_full = _lu_with_pivot(q.astype(np.float32))
    w_s = np.diag(w_u_full).copy()
    w_u = np.triu(w_u_full, 1)
    s_sign = np.sign(w_s)
    f32 = lambda a: jnp.asarray(a, dtype=jnp.float32)
    return {
        "w_p": f32(w_p),
        "w_l": f32(w_l),
        "w_u": f32(w_u),
        "w_s": f32(np.log(np.abs(w_s))).reshape(1, in_channel),   # trainable log|s|
        "s_sign": f32(s_sign).reshape(1, in_channel),
    }


# ----------------------------------------------------------------------------
# Weight recomposition (tiny CxC math; plain XLA in the wrapper, per review):
#   W = P @ (L * lower_mask + I) @ (U * upper_mask + diag(s_sign * exp(w_s)))
# ----------------------------------------------------------------------------
def _compose_weight(params):
    c = params["w_p"].shape[0]
    ws = params["w_s"].reshape(c)
    ssign = params["s_sign"].reshape(c)
    l_mask = jnp.tril(jnp.ones((c, c), jnp.float32), -1)
    u_mask = jnp.triu(jnp.ones((c, c), jnp.float32), 1)
    eye = jnp.eye(c, dtype=jnp.float32)
    return (params["w_p"]
            @ (params["w_l"] * l_mask + eye)
            @ (params["w_u"] * u_mask + jnp.diag(ssign * jnp.exp(ws))))


# ----------------------------------------------------------------------------
# Streaming 1x1 conv == channel-mixing matmul on (Nb, C, tile) pixel slabs.
# ----------------------------------------------------------------------------
def _conv1x1_kernel(w_ref, x_ref, out_ref):
    w = w_ref[...]
    # Nb is small and static -> unrolled matmuls; MXU slot has huge slack (HBM-bound).
    for b in range(x_ref.shape[0]):
        out_ref[b] = jnp.dot(w, x_ref[b],
                             preferred_element_type=jnp.float32).astype(out_ref.dtype)


def _round_up(a, m):
    return -(-a // m) * m


def _pick_block(n, c, hw, elt_bytes, budget_bytes):
    """Pick (Nb, tile, grid) so 2-buffered (in+out) blocks fit budget_bytes.

    Prefers tile == full HW (one contiguous DMA per image, fewer descriptors),
    batches several images per block, and guarantees >= 2 grid steps (v7x megacore).
    """
    # working set ~= 2 buffers * (in block + out block) = 4 * Nb*C*tile*elt
    max_block_elems = max(128, budget_bytes // (4 * elt_bytes))   # cap on Nb*C*tile

    if c * hw <= max_block_elems:
        tile = hw                                   # full-extent lane dim (always legal)
        nb = min(n, max(1, max_block_elems // (c * hw)))
    else:
        nb = 1
        tile = max(128, ((max_block_elems // c) // 128) * 128)    # 128-multiple lane tile

    grid = (pl.cdiv(n, nb), pl.cdiv(hw, tile))
    if grid[0] * grid[1] < 2:                       # give both TensorCores work on v7x
        if nb > 1:
            nb = -(-nb // 2)
        elif tile == hw and hw > 256:
            tile = _round_up(-(-hw // 2), 128)
        grid = (pl.cdiv(n, nb), pl.cdiv(hw, tile))
    return nb, tile, grid


def invconv2dlu_forward(x, params, vmem_budget_bytes=24 * 2**20):
    """x: (N, C, H, W) float32.  Returns (out NCHW, logdet scalar)."""
    n, c, h, w = x.shape
    hw = h * w

    # (1) Compose the (C, C) conv weight once (plain jnp — no extra kernel launch).
    weight = _compose_weight(params)

    # (2) Free layout change: NCHW -> (N, C, H*W). No transpose, no extra HBM traffic.
    x3 = x.reshape(n, c, hw)

    elt = x.dtype.itemsize
    nb, tile, grid = _pick_block(n, c, hw, elt, vmem_budget_bytes)

    # Explicit VMEM budget: double-buffered (in + out) blocks + double-buffered weight.
    block_bytes = nb * c * tile * elt
    need = 2 * 2 * block_bytes + 2 * c * c * 4
    vmem_limit = int(min(56 * 2**20, max(4 * 2**20, need + 4 * 2**20)))

    y3 = pl.pallas_call(
        _conv1x1_kernel,
        out_shape=jax.ShapeDtypeStruct((n, c, hw), x.dtype),
        grid=grid,
        in_specs=[pl.BlockSpec((c, c), lambda i, j: (0, 0)),
                  pl.BlockSpec((nb, c, tile), lambda i, j: (i, 0, j))],
        out_specs=pl.BlockSpec((nb, c, tile), lambda i, j: (i, 0, j)),
        compiler_params=pltpu.CompilerParams(
            dimension_semantics=("parallel", "parallel"),
            vmem_limit_bytes=vmem_limit),
    )(weight, x3)

    out = y3.reshape(n, c, h, w)
    # logdet = H * W * sum(log|s|): trivial C-element reduction, done in the wrapper.
    logdet = jnp.float32(h * w) * jnp.sum(params["w_s"])
    return out, logdet


# ----------------------------------------------------------------------------
# Pure-JAX reference (matches the PyTorch forward semantics)
# ----------------------------------------------------------------------------
def _reference_forward(x, params):
    c = x.shape[1]
    h, w_ = x.shape[2], x.shape[3]
    ws = params["w_s"].reshape(c)
    ssign = params["s_sign"].reshape(c)
    l_mask = jnp.tril(jnp.ones((c, c), jnp.float32), -1)
    u_mask = jnp.triu(jnp.ones((c, c), jnp.float32), 1)
    eye = jnp.eye(c, dtype=jnp.float32)
    weight = (params["w_p"]
              @ (params["w_l"] * l_mask + eye)
              @ (params["w_u"] * u_mask + jnp.diag(ssign * jnp.exp(ws))))
    out = jnp.einsum("oi,nihw->nohw", weight, x)
    logdet = h * w_ * jnp.sum(ws)
    return out, logdet


if __name__ == "__main__":
    C = 4
    N, H, W = 2, 16, 16

    params = init_params(C, seed=0)
    x = jax.random.normal(jax.random.PRNGKey(0), (N, C, H, W), dtype=jnp.float32)

    fwd = jax.jit(invconv2dlu_forward)
    out, logdet = fwd(x, params)
    out = jax.block_until_ready(out)
    logdet = jax.block_until_ready(logdet)

    out_ref, logdet_ref = _reference_forward(x, params)
    assert out.shape == (N, C, H, W) and out.dtype == jnp.float32
    assert np.allclose(np.asarray(out), np.asarray(out_ref), rtol=1e-3, atol=1e-3)
    assert np.allclose(np.asarray(logdet), np.asarray(logdet_ref), rtol=1e-4, atol=1e-4)

    # TODO(synk): reverse() (1x1 conv with the matrix inverse) is not implemented — forward only.
    print("KERNEL_OK")
</pallas_src>

<mosaic_0001>
module attributes {stable_mosaic.version = 11 : i64} {
  func.func @_conv1x1_kernel(%arg0: i32, %arg1: i32, %arg2: memref<4x4xf32, #tpu.memory_space<vmem>>, %arg3: memref<1x4x256xf32, #tpu.memory_space<vmem>>, %arg4: memref<1x4x256xf32, #tpu.memory_space<vmem>>) attributes {dimension_semantics = [#tpu.dimension_semantics<parallel>, #tpu.dimension_semantics<parallel>], iteration_bounds = array<i64: 2, 1>, scalar_prefetch = 0 : i64, scratch_operands = 0 : i64, tpu.core_type = #tpu.core_type<tc>, window_params = [{pipeline_mode = #tpu.pipeline_mode<synchronous>, transform_indices = @transform_0, window_bounds = array<i64: 4, 4>}, {transform_indices = @transform_1, window_bounds = array<i64: 1, 4, 256>}, {transform_indices = @transform_2, window_bounds = array<i64: 1, 4, 256>}]} {
    %c0 = arith.constant 0 : index
    %c0_0 = arith.constant 0 : index
    %0 = vector.load %arg2[%c0, %c0_0] : memref<4x4xf32, #tpu.memory_space<vmem>>, vector<4x4xf32>
    %c0_1 = arith.constant 0 : index
    %c0_2 = arith.constant 0 : index
    %c0_3 = arith.constant 0 : index
    %1 = vector.load %arg3[%c0_1, %c0_2, %c0_3] : memref<1x4x256xf32, #tpu.memory_space<vmem>>, vector<1x4x256xf32>
    %2 = vector.shape_cast %1 : vector<1x4x256xf32> to vector<4x256xf32>
    %cst = arith.constant dense<0.000000e+00> : vector<4x256xf32>
    %3 = tpu.matmul %0, %2, %cst {dimension_numbers = #tpu.dot_dimension_numbers<[1], [0], [0], [1], [0, 0, 1, 1], [], []>} : vector<4x4xf32>, vector<4x256xf32>, vector<4x256xf32> -> vector<4x256xf32>
    %c0_4 = arith.constant 0 : index
    %c0_5 = arith.constant 0 : index
    %c0_6 = arith.constant 0 : index
    %4 = vector.load %arg4[%c0_4, %c0_5, %c0_6] : memref<1x4x256xf32, #tpu.memory_space<vmem>>, vector<1x4x256xf32>
    %5 = vector.shape_cast %4 : vector<1x4x256xf32> to vector<4x256xf32>
    %6 = vector.shape_cast %3 : vector<4x256xf32> to vector<1x4x256xf32>
    tpu.vector_store %arg4[%c0_4, %c0_5, %c0_6], %6 {strides = array<i32>} : memref<1x4x256xf32, #tpu.memory_space<vmem>>, vector<1x4x256xf32>,
    return
  }
  func.func @transform_0(%arg0: i32, %arg1: i32) -> (i32, i32) {
    %c0_i32 = arith.constant 0 : i32
    %c0_i32_0 = arith.constant 0 : i32
    %c0_i32_1 = arith.constant 0 : i32
    return %c0_i32, %c0_i32_0 : i32, i32
  }
  func.func @transform_1(%arg0: i32, %arg1: i32) -> (i32, i32, i32) {
    %c0_i32 = arith.constant 0 : i32
    %c0_i32_0 = arith.constant 0 : i32
    return %arg0, %c0_i32, %arg1 : i32, i32, i32
  }
  func.func @transform_2(%arg0: i32, %arg1: i32) -> (i32, i32, i32) {
    %c0_i32 = arith.constant 0 : i32
    %c0_i32_0 = arith.constant 0 : i32
    return %arg0, %c0_i32, %arg1 : i32, i32, i32
  }
}

</mosaic_0001>

<bundles_post_ra>
// kernel: invconv2dlu_forward.1
= control target key start
LH: loop header
LB: loop body
LE: loop exit
PB: predicated region body
PF: predicated region fallthrough
CT: control target
= control target key end

     0   :  { %s441_s9 = smov 0   ;;  %s443_s10 = smov 0   ;;  %s474_s0 = inlined_call_operand.vmem [shape: f32[4,4], index: 0, kind: input, shape index: {}]   ;;  %s475_s1 = inlined_call_operand.vmem [shape: f32[2,4,256], index: 1, kind: input, shape index: {}]   ;;  %s476_s2 = inlined_call_operand.vmem [shape: f32[2,4,256], index: 2, kind: output, shape index: {}]  }
   0x1   :  { %s445_s11 = smov 0  }
   0x2 LB: > { %s24_s12 = sadd.s32 1, %s419_s10  ;;  %p363_p0 = scmp.ge.s32.totalorder %s423_s11, 1  ;;  %s423_s11 = sphi %s445_s11, %s12_s11   ;;  %s419_s10 = sphi %s443_s10, %s478_s10   ;;  %s415_s9 = sphi %s441_s9, %s477_s9  }
   0x3   : > { %p26_p1 = scmp.ge.s32.totalorder %s24_s12, 2  ;;  %p133_p2 = scmp.lt.s32.totalorder %s423_s11, 3 }
   0x5   : > { %s480_s12 = smov (%p26_p1, %s24_s12), 0  ;;  %p134_p3 = pnand %p363_p0, %p133_p2 }
   0x6   : > { %p164_p4 = scmp.lt.s32.totalorder (!%p134_p3), %s415_s9, 1  ;;  %v425_v0 = vmov (!%p134_p3), 0.0   ;;  %vm191_vm0 = vcmask (!%p134_p3), 1043456   ;;  %v183_v3 = vld [vmem:[%s474_s0] sm:$0xf] (!%p134_p3)  ;;  %vm187_vm1 = vcmask (!%p134_p3), 31744  }
   0x7   : > { %137 = sbr.rel (%p134_p3) target bundleno = 238 (0xee), region = 28  ;;  %260 = vmatprep.mubr.f32.mxu0 (!%p134_p3), %v425_v0 }
   0xe   : > { %s482_s9 = smov (!%p164_p4, %s415_s9), 1 }
   0xf   : > { %s373_s13 = sshll.u32 %s482_s9, 3 }
  0x10   : > { %s171_s16 = scalar_lea.vmem %s475_s1, %s373_s13  ;;  %s181_s21 = scalar_lea.vmem %s476_s2, %s373_s13 }
  0x11   : > { %v184_v1 = vld [vmem:[%s171_s16] sm:$0xff] }
  0x12   : > { %v186_v2 = vcombine.high %v184_v1, %v184_v1 }
  0x14   : > { %368 = vmatprep.subr.msk.mxu0 %vm191_vm0, %v186_v2 }
  0x15   : > { %369 = vmatpush1.msk.msra.mxu0 %vm191_vm0, %v184_v1 }
  0x16   : > { %370 = vmatmul.mubr.msk.f32.vlgmr.msra.gmra.mrb[0].mxu0 %vm187_vm1, %v183_v3 }
  0xe9   : > { %v262_v4 = vpop.f32.mrb[0].mxu0 }
  0xea   : > { %v264_v5 = vpop.f32.mrb[1].mxu0 }
  0xeb   : > { %v269_v6 = vcombine.low %v262_v4, %v264_v5 }
  0xed   : > { %271 = vst [vmem:[%s181_s21] sm:$0xff] %v269_v6 }
  0xee PF: > { %s12_s11 = sadd.s32 1, %s423_s11   ;;  %s477_s9 = smov %s419_s10 }
  0xef   : > { %p9_p5 = scmp.ge.s32.totalorder %s12_s11, 4   ;;  %s478_s10 = smov %s480_s12 }
  0xf1   :  { %11 = sbr.rel (!%p9_p5) target bundleno = 2 (0x2), region = 58 }

</bundles_post_ra>
